<compile_context>
chip_gen: v7x
topology: tpu7x:2x2x1
jax: 0.10.0
libtpu: 0.0.40
codegen_flags: <defaults>
</compile_context>

<pallas_src>
import jax
import jax.numpy as jnp
from jax.experimental import pallas as pl
from jax.experimental.pallas import tpu as pltpu


# ---------------------------------------------------------------------------
# Kernel math shared by both blocking variants
# ---------------------------------------------------------------------------
def _compute_weight_maps(s, s_next_row, bias0, bias1, lam_cst, lam_apt, inv_sigma):
    """s: f32[TH, W] channel-summed rows; s_next_row: f32[1, W] row below the
    tile (zeros at the bottom image border).  Returns (w0, w1) f32[TH, W]."""
    TH, W = s.shape

    # Horizontal forward difference: neighbour at w+1, zero-padded at w = W-1.
    zcol = jnp.zeros((TH, 1), s.dtype)
    s_right = jnp.concatenate([s[:, 1:], zcol], axis=1)       # s[h, w+1]

    # Vertical forward difference: neighbour at h+1; the row below the tile is
    # supplied by the caller (halo row, or zeros at the image border).
    s_down = jnp.concatenate([s[1:, :], s_next_row], axis=0)  # s[h+1, w]

    d0 = (s_right - s) + bias0
    d1 = (s_down - s) + bias1
    w0 = lam_cst + lam_apt * jnp.exp(-inv_sigma * (d0 * d0))
    w1 = lam_cst + lam_apt * jnp.exp(-inv_sigma * (d1 * d1))
    return w0, w1


def _weights_kernel_full(params_ref, x_ref, o_ref):
    """Whole image for one batch element per grid step (grid = (B,)).
    Used when H is small / not tileable in multiples of 8."""
    lam_cst, lam_apt, inv_sigma = params_ref[0], params_ref[1], params_ref[2]
    # params_ref[3] is alpha: declared by the module but unused by torch forward.
    bias0, bias1 = params_ref[4], params_ref[5]

    s = jnp.sum(x_ref[...], axis=0)                 # (H, W)
    zero_row = jnp.zeros((1, s.shape[1]), s.dtype)  # bottom border = conv zero pad
    w0, w1 = _compute_weight_maps(s, zero_row, bias0, bias1,
                                  lam_cst, lam_apt, inv_sigma)
    o_ref[0] = w0
    o_ref[1] = w1


def _weights_kernel_tiled(params_ref, x_ref, halo_ref, o_ref):
    """One (batch, H-tile) per grid step.  halo_ref holds the 8 input rows
    starting at the first row *below* this tile (block index clamped at the
    image bottom; the kernel masks it to zero padding on the last tile)."""
    lam_cst, lam_apt, inv_sigma = params_ref[0], params_ref[1], params_ref[2]
    bias0, bias1 = params_ref[4], params_ref[5]

    s = jnp.sum(x_ref[...], axis=0)                 # (TH, W)
    nxt = jnp.sum(halo_ref[:, 0:1, :], axis=0)      # (1, W) = channel-sum of row below
    is_last = pl.program_id(1) == pl.num_programs(1) - 1
    nxt = nxt * jnp.where(is_last, 0.0, 1.0)        # conv zero padding at the bottom

    w0, w1 = _compute_weight_maps(s, nxt, bias0, bias1,
                                  lam_cst, lam_apt, inv_sigma)
    o_ref[0] = w0
    o_ref[1] = w1


# ---------------------------------------------------------------------------
# Wrappers
# ---------------------------------------------------------------------------
def _choose_tile_h(C, H, W, vmem_budget_bytes=6 * 1024 * 1024):
    """Largest H-tile that divides H, is a multiple of 8 (sublane tiling rule),
    and keeps the double-buffered per-step VMEM footprint under budget."""
    def footprint(th):
        # 2x (double buffer) * [(C in + 2 out) planes * th * W + C * 8-row halo] * 4B
        return 2 * 4 * ((C + 2) * th * W + C * 8 * W)

    if H % 8 != 0:
        return H  # whole-H blocks are exempt from the (8,128) divisibility rule
    divisors = [th for th in range(8, H + 1, 8) if H % th == 0]
    fitting = [th for th in divisors if footprint(th) <= vmem_budget_bytes]
    if not fitting:
        return 8  # TODO(synk): tile W too for extremely wide images
    return max(fitting)


def weights_forward_chw(img, params, *, tile_h=None):
    """Kernel-native layout: img f32[B,C,H,W], params f32[6] -> f32[B,2,H,W].

    Prefer this channel-first variant when the consumer can index channel-first:
    it skips the (B,H,W,2) permute, which otherwise re-streams the whole output
    through HBM with a last dim of 2 (worst-case layout)."""
    B, C, H, W = img.shape
    if tile_h is None:
        tile_h = _choose_tile_h(C, H, W)
    tile_h = min(int(tile_h), H)

    out_shape = jax.ShapeDtypeStruct((B, 2, H, W), img.dtype)
    cost = pl.CostEstimate(                       # memory-bound custom call
        flops=int(B * H * W * (C + 12)),
        transcendentals=int(2 * B * H * W),
        bytes_accessed=int(4 * B * H * W * (C + 2)),
    )

    tiled = (tile_h < H) and (H % tile_h == 0) and (tile_h % 8 == 0)

    if not tiled:
        # Small-image path: one contiguous (C,H,W) block per batch element.
        return pl.pallas_call(
            _weights_kernel_full,
            out_shape=out_shape,
            grid=(B,),
            in_specs=[
                pl.BlockSpec(memory_space=pltpu.SMEM),                  # scalar params
                pl.BlockSpec((None, C, H, W), lambda b: (b, 0, 0, 0)),
            ],
            out_specs=pl.BlockSpec((None, 2, H, W), lambda b: (b, 0, 0, 0)),
            compiler_params=pltpu.CompilerParams(
                dimension_semantics=("parallel",)),
            cost_estimate=cost,
        )(params, img)

    n_h = H // tile_h
    th8 = tile_h // 8            # tile height in 8-row blocks
    n_h8 = H // 8                # image height in 8-row blocks

    return pl.pallas_call(
        _weights_kernel_tiled,
        out_shape=out_shape,
        grid=(B, n_h),
        in_specs=[
            pl.BlockSpec(memory_space=pltpu.SMEM),                      # scalar params
            # main (C, tile_h, W) tile of this batch element
            pl.BlockSpec((None, C, tile_h, W), lambda b, i: (b, 0, i, 0)),
            # 8-row halo: first row below this tile (block index clamped at bottom)
            pl.BlockSpec((None, C, 8, W),
                         lambda b, i: (b, 0, jnp.minimum((i + 1) * th8, n_h8 - 1), 0)),
        ],
        out_specs=pl.BlockSpec((None, 2, tile_h, W), lambda b, i: (b, 0, i, 0)),
        compiler_params=pltpu.CompilerParams(
            dimension_semantics=("parallel", "parallel")),
        cost_estimate=cost,
    )(params, img, img)


def weights_forward(img, params, *, tile_h=None):
    """Torch-matching layout: img f32[B,C,H,W], params f32[6] -> f32[B,H,W,2]."""
    out_bchw = weights_forward_chw(img, params, tile_h=tile_h)
    # Glue matching PyTorch's permute(0, 2, 3, 1).  Pure layout overhead for a
    # memory-bound op — consumers should prefer weights_forward_chw when possible.
    return jnp.transpose(out_bchw, (0, 2, 3, 1))


def weights_reference(img, params):
    """Pure-JAX reference mirroring the PyTorch forward (for validation)."""
    lam_cst, lam_apt, inv_sigma = params[0], params[1], params[2]
    bias0, bias1 = params[4], params[5]
    s = jnp.sum(img, axis=1)                               # (B, H, W)
    s_right = jnp.pad(s[:, :, 1:], ((0, 0), (0, 0), (0, 1)))
    s_down = jnp.pad(s[:, 1:, :], ((0, 0), (0, 1), (0, 0)))
    d0 = (s_right - s) + bias0
    d1 = (s_down - s) + bias1
    ttt = jnp.stack([d0, d1], axis=-1)                     # (B, H, W, 2)
    return lam_cst + lam_apt * jnp.exp(-inv_sigma * ttt ** 2.0)


if __name__ == "__main__":
    key = jax.random.PRNGKey(0)
    k_img, k_bias, k_img2 = jax.random.split(key, 3)

    # Shapes implied by the module: batch=2, channels=4, spatial=16.
    B, C, H, W = 2, 4, 16, 16
    img = jax.random.normal(k_img, (B, C, H, W), dtype=jnp.float32)

    # Module parameters (defaults from __init__); alpha unused by torch forward.
    lambda_cst, lambda_apt, inv_sigma, alpha = 0.01, 0.1, 1.0, 2.0
    # Conv bias: torch default init U(-1/sqrt(fan_in), 1/sqrt(fan_in)), fan_in = C*3*3.
    bound = 1.0 / float(jnp.sqrt(jnp.float32(C * 3 * 3)))
    bias = jax.random.uniform(k_bias, (2,), jnp.float32, minval=-bound, maxval=bound)
    params = jnp.array([lambda_cst, lambda_apt, inv_sigma, alpha,
                        float(bias[0]), float(bias[1])], dtype=jnp.float32)

    ref = weights_reference(img, params)

    # 1) Default path (small image -> whole-image block per batch element).
    out = jax.block_until_ready(weights_forward(img, params))
    assert out.shape == (B, H, W, 2), out.shape
    assert jnp.allclose(out, ref, atol=1e-5, rtol=1e-5), "mismatch (full path)"

    # 2) Force the H-tiled + halo path (what large images take automatically).
    out_t = jax.block_until_ready(weights_forward(img, params, tile_h=8))
    assert jnp.allclose(out_t, ref, atol=1e-5, rtol=1e-5), "mismatch (tiled path)"

    # 3) Channel-first (kernel-native) variant on a lane-aligned tiled shape.
    B2, C2, H2, W2 = 1, 3, 64, 128
    img2 = jax.random.normal(k_img2, (B2, C2, H2, W2), dtype=jnp.float32)
    out2 = jax.block_until_ready(weights_forward_chw(img2, params, tile_h=16))
    ref2 = jnp.transpose(weights_reference(img2, params), (0, 3, 1, 2))
    assert out2.shape == (B2, 2, H2, W2), out2.shape
    assert jnp.allclose(out2, ref2, atol=1e-5, rtol=1e-5), "mismatch (chw/tiled path)"

    print("KERNEL_OK")
</pallas_src>

<mosaic_0001>
module attributes {stable_mosaic.version = 11 : i64} {
  func.func @_weights_kernel_full(%arg0: i32, %arg1: memref<6xf32, #tpu.memory_space<smem>>, %arg2: memref<1x4x16x16xf32, #tpu.memory_space<vmem>>, %arg3: memref<1x2x16x16xf32, #tpu.memory_space<vmem>>) attributes {dimension_semantics = [#tpu.dimension_semantics<parallel>], iteration_bounds = array<i64: 2>, scalar_prefetch = 0 : i64, scratch_operands = 0 : i64, tpu.core_type = #tpu.core_type<tc>, window_params = [{transform_indices = @transform_0, window_bounds = array<i64: 6>}, {transform_indices = @transform_1, window_bounds = array<i64: 1, 4, 16, 16>}, {transform_indices = @transform_2, window_bounds = array<i64: 1, 2, 16, 16>}]} {
    %c0 = arith.constant 0 : index
    %0 = memref.load %arg1[%c0] : memref<6xf32, #tpu.memory_space<smem>>
    %c1 = arith.constant 1 : index
    %1 = memref.load %arg1[%c1] : memref<6xf32, #tpu.memory_space<smem>>
    %c2 = arith.constant 2 : index
    %2 = memref.load %arg1[%c2] : memref<6xf32, #tpu.memory_space<smem>>
    %c4 = arith.constant 4 : index
    %3 = memref.load %arg1[%c4] : memref<6xf32, #tpu.memory_space<smem>>
    %c5 = arith.constant 5 : index
    %4 = memref.load %arg1[%c5] : memref<6xf32, #tpu.memory_space<smem>>
    %c0_0 = arith.constant 0 : index
    %c0_1 = arith.constant 0 : index
    %c0_2 = arith.constant 0 : index
    %c0_3 = arith.constant 0 : index
    %5 = vector.load %arg2[%c0_0, %c0_1, %c0_2, %c0_3] : memref<1x4x16x16xf32, #tpu.memory_space<vmem>>, vector<1x4x16x16xf32>
    %6 = vector.shape_cast %5 : vector<1x4x16x16xf32> to vector<4x16x16xf32>
    %cst = arith.constant dense<0.000000e+00> : vector<16x16xf32>
    %7 = vector.multi_reduction <add>, %6, %cst [0] : vector<4x16x16xf32> to vector<16x16xf32>
    %cst_4 = arith.constant 0.000000e+00 : f32
    %8 = vector.broadcast %cst_4 : f32 to vector<1x16xf32>
    %cst_5 = arith.constant 0.000000e+00 : f32
    %9 = vector.broadcast %cst_5 : f32 to vector<16x1xf32>
    %10 = vector.extract_strided_slice %7 {offsets = [0, 1], sizes = [16, 15], strides = [1, 1]} : vector<16x16xf32> to vector<16x15xf32>
    %11 = tpu.concatenate %10, %9 in 1 : vector<16x15xf32>, vector<16x1xf32> -> vector<16x16xf32>
    %12 = vector.extract_strided_slice %7 {offsets = [1, 0], sizes = [15, 16], strides = [1, 1]} : vector<16x16xf32> to vector<15x16xf32>
    %13 = tpu.concatenate %12, %8 in 0 : vector<15x16xf32>, vector<1x16xf32> -> vector<16x16xf32>
    %14 = arith.subf %11, %7 : vector<16x16xf32>
    %15 = vector.broadcast %3 : f32 to vector<16x16xf32>
    %16 = arith.addf %14, %15 : vector<16x16xf32>
    %17 = arith.subf %13, %7 : vector<16x16xf32>
    %18 = vector.broadcast %4 : f32 to vector<16x16xf32>
    %19 = arith.addf %17, %18 : vector<16x16xf32>
    %cst_6 = arith.constant 0.000000e+00 : f32
    %20 = arith.subf %cst_6, %2 : f32
    %21 = arith.mulf %16, %16 : vector<16x16xf32>
    %22 = vector.broadcast %20 : f32 to vector<16x16xf32>
    %23 = arith.mulf %22, %21 : vector<16x16xf32>
    %24 = math.exp %23 : vector<16x16xf32>
    %25 = vector.broadcast %1 : f32 to vector<16x16xf32>
    %26 = arith.mulf %25, %24 : vector<16x16xf32>
    %27 = vector.broadcast %0 : f32 to vector<16x16xf32>
    %28 = arith.addf %27, %26 : vector<16x16xf32>
    %cst_7 = arith.constant 0.000000e+00 : f32
    %29 = arith.subf %cst_7, %2 : f32
    %30 = arith.mulf %19, %19 : vector<16x16xf32>
    %31 = vector.broadcast %29 : f32 to vector<16x16xf32>
    %32 = arith.mulf %31, %30 : vector<16x16xf32>
    %33 = math.exp %32 : vector<16x16xf32>
    %34 = vector.broadcast %1 : f32 to vector<16x16xf32>
    %35 = arith.mulf %34, %33 : vector<16x16xf32>
    %36 = vector.broadcast %0 : f32 to vector<16x16xf32>
    %37 = arith.addf %36, %35 : vector<16x16xf32>
    %c0_8 = arith.constant 0 : index
    %c0_9 = arith.constant 0 : index
    %c0_10 = arith.constant 0 : index
    %c0_11 = arith.constant 0 : index
    %38 = vector.load %arg3[%c0_8, %c0_9, %c0_10, %c0_11] : memref<1x2x16x16xf32, #tpu.memory_space<vmem>>, vector<1x1x16x16xf32>
    %39 = vector.shape_cast %38 : vector<1x1x16x16xf32> to vector<16x16xf32>
    %40 = vector.shape_cast %28 : vector<16x16xf32> to vector<1x1x16x16xf32>
    tpu.vector_store %arg3[%c0_8, %c0_9, %c0_10, %c0_11], %40 {strides = array<i32>} : memref<1x2x16x16xf32, #tpu.memory_space<vmem>>, vector<1x1x16x16xf32>,
    %c0_12 = arith.constant 0 : index
    %c1_13 = arith.constant 1 : index
    %c0_14 = arith.constant 0 : index
    %c0_15 = arith.constant 0 : index
    %41 = vector.load %arg3[%c0_12, %c1_13, %c0_14, %c0_15] : memref<1x2x16x16xf32, #tpu.memory_space<vmem>>, vector<1x1x16x16xf32>
    %42 = vector.shape_cast %41 : vector<1x1x16x16xf32> to vector<16x16xf32>
    %43 = vector.shape_cast %37 : vector<16x16xf32> to vector<1x1x16x16xf32>
    tpu.vector_store %arg3[%c0_12, %c1_13, %c0_14, %c0_15], %43 {strides = array<i32>} : memref<1x2x16x16xf32, #tpu.memory_space<vmem>>, vector<1x1x16x16xf32>,
    return
  }
  func.func @transform_0(%arg0: i32) -> i32 {
    %c0_i32 = arith.constant 0 : i32
    %c0_i32_0 = arith.constant 0 : i32
    return %c0_i32 : i32
  }
  func.func @transform_1(%arg0: i32) -> (i32, i32, i32, i32) {
    %c0_i32 = arith.constant 0 : i32
    %c0_i32_0 = arith.constant 0 : i32
    %c0_i32_1 = arith.constant 0 : i32
    %c0_i32_2 = arith.constant 0 : i32
    return %arg0, %c0_i32, %c0_i32_0, %c0_i32_1 : i32, i32, i32, i32
  }
  func.func @transform_2(%arg0: i32) -> (i32, i32, i32, i32) {
    %c0_i32 = arith.constant 0 : i32
    %c0_i32_0 = arith.constant 0 : i32
    %c0_i32_1 = arith.constant 0 : i32
    %c0_i32_2 = arith.constant 0 : i32
    return %arg0, %c0_i32, %c0_i32_0, %c0_i32_1 : i32, i32, i32, i32
  }
}

</mosaic_0001>

<bundles_post_ra>
// kernel: tpu_custom_call.1
= control target key start
LH: loop header
LB: loop body
LE: loop exit
PB: predicated region body
PF: predicated region fallthrough
CT: control target
= control target key end

     0   :  { %7 = vsyncpa [#allocation5], 0  ;;  %s804_s0 = inlined_call_operand.hbm [shape: f32[6], index: 0, kind: input, shape index: {}]   ;;  %s805_s1 = inlined_call_operand.hbm [shape: f32[2,4,16,16], index: 1, kind: input, shape index: {}]   ;;  %s806_s2 = inlined_call_operand.hbm [shape: f32[2,2,16,16], index: 2, kind: output, shape index: {}]  }
   0x1   :  { %8 = vsyncpa [#allocation3], 0 }
   0x2   :  { %10 = vsyncpa [#allocation3 + $0x1], 0 }
   0x3   :  { %11 = vsyncpa [#allocation4], 0 }
   0x4   :  { %13 = vsyncpa [#allocation4 + $0x1], 0  ;;  %s594_s9 = smov 0   ;;  %s596_s10 = smov 0  }
   0x5   :  { %s598_s11 = smov 0   ;;  %s600_s12 = smov 0  }
   0x6 LB: > { %s615_s13 = sadd.s32 4294967295, %s569_s12   ;;  %s362_s14 = sadd.s32 4294967294, %s569_s12   ;;  %s569_s12 = sphi %s600_s12, %s826_s12   ;;  %s565_s11 = sphi %s598_s11, %s825_s11   ;;  %s561_s10 = sphi %s596_s10, %s824_s10   ;;  %s557_s9 = sphi %s594_s9, %s823_s9  }
   0x7   : > { %s619_s15 = sadd.s32 1, %s569_s12   ;;  %s47_s16 = sadd.s32 1, %s565_s11 }
   0x8   : > { %s44_s17 = ssub.s32 %s569_s12, %s619_s15  ;;  %p54_p0 = scmp.ne.s32.totalorder %s565_s11, %s561_s10 }
   0x9   : > { %p45_p1 = scmp.eq.s32.totalorder %s44_s17, 0  ;;  %p55_p2 = scmp.eq.s32.totalorder %s569_s12, 0 }
   0xa   : > { %p60_p3 = scmp.ne.s32.totalorder %s561_s10, %s557_s9  ;;  %p807_p4 = scmp.eq.s32.totalorder %s615_s13, 0 }
   0xb   : > { %s631_s18 = scalar_select %p45_p1, %s565_s11, %s47_s16  }
   0xc   : > { %p633_p5 = por %p55_p2, %p54_p0  ;;  %p639_p6 = por %p807_p4, %p60_p3 }
   0xd   : > { %p84_p7 = scmp.eq.s32.totalorder %s615_s13, 1  ;;  %p90_p8 = scmp.eq.s32.totalorder %s362_s14, 1 }
   0xe   : > { %s811_s20 = scalar_select %p639_p6, 1, 0 }
   0xf   : > { %p363_p9 = scmp.ge.s32.totalorder %s569_s12, 1  ;;  %p97_p10 = scmp.lt.s32.totalorder %s569_s12, 3 }
  0x10   : > { %p646_p11 = por %p84_p7, %p54_p0  ;;  %p650_p12 = por %p90_p8, %p60_p3 }
  0x11   : > { %p654_p13 = pnand %p363_p9, %p97_p10  ;;  %p407_p4 = scmp.lt.s32.totalorder %s569_s12, 2 }
  0x12   : > { %s812_s21 = scalar_select %p646_p11, 1, 0 }
  0x13   : > { %s813_s22 = scalar_select %p650_p12, 1, 0 }
  0x14   : > { %p394_p2 = pneg %p654_p13  ;;  %s119_s24 = sand.u32 1, %s565_s11  }
  0x15   : > { %s384_s25 = sshll.u32 %s569_s12, 10  ;;  %p815_p6 = scmp.eq.s32.totalorder %s615_s13, 0 }
  0x16   : > { %p668_p7 = pnand %p407_p4, %p633_p5  ;;  %s366_s27 = sshll.u32 %s119_s24, 6 }
  0x17   : > { %p395_p0 = pnand %p394_p2, %p815_p6  ;;  %s456_s30 = scalar_lea.hbm %s804_s0, 16 }
  0x18   : > { %p457_p3 = scmp.ne.s32.totalorder %s804_s0, %s456_s30  ;;  %p463_p6 = scmp.lt.u32.totalorder %s456_s30, %s804_s0 }
  0x19   : > { %p458_p8 = pneg %p395_p0 }
  0x1b   : > { %p459_p9 = pnand %p458_p8, %p457_p3 }
  0x1d   : > { %p460_p10 = pneg %p459_p9 }
  0x1f   : > { %p465_p4 = pnand %p463_p6, %p460_p10 }
  0x21   : > { %468 = shalt.err (!%p465_p4)
}
  0x22   : > { %s571_s7 = smov [#allocation2]   ;;  %s687_s19 = scalar_lea.hbm %s805_s1, %s384_s25 }
  0x23   : > { %397 = dma.hbm_to_smem (!%p395_p0), %s804_s0, 16, %s571_s7, [#allocation5]  }
  0x24   : > { %s123_s28 = scalar_lea.vmem [#allocation6], %s366_s27  ;;  %s691_s30 = scalar_lea.sflag [#allocation3], %s119_s24 }
  0x25   : > { %s130_s29 = sshll.u32 %s123_s28, 4  ;;  %s469_s3 = scalar_lea.hbm %s687_s19, 1024  ;;  %s689_s29 = int_to_ptr.vmem [resolvable:$true] %s130_s29 }
  0x26   : > { %p470_p5 = scmp.ne.s32.totalorder %s687_s19, %s469_s3  ;;  %p471_p2 = pneg %p668_p7 }
  0x27   : > { %s474_s5 = scalar_lea.hbm %s805_s1, 2048  ;;  %p475_p8 = scmp.lt.u32.totalorder %s687_s19, %s805_s1 }
  0x28   : > { %p472_p0 = pnand %p471_p2, %p470_p5  ;;  %p476_p9 = scmp.lt.u32.totalorder %s474_s5, %s469_s3 }
  0x29   : > { %p478_p6 = scmp.lt.u32.totalorder %s469_s3, %s687_s19 }
  0x2a   : > { %p473_p3 = pneg %p472_p0  ;;  %p477_p10 = por %p476_p9, %p475_p8 }
  0x2c   : > { %p479_p4 = por %p478_p6, %p477_p10 }
  0x2e   : > { %p480_p1 = pnand %p479_p4, %p473_p3 }
  0x30   : > { %483 = shalt.err (!%p480_p1)
}
  0x31   : > { %s484_s24 = scalar_lea.vmem %s689_s29, 1024  ;;  %s572_s27 = smov [#allocation6]  }
  0x32   : > { %p485_p5 = scmp.ne.s32.totalorder %s689_s29, %s484_s24  ;;  %s489_s8 = sshll.u32 %s572_s27, 4  ;;  %s490_s8 = int_to_ptr.vmem [resolvable:$false] %s489_s8 }
  0x33   : > { %s491_s14 = scalar_lea.vmem %s490_s8, 2048  ;;  %p492_p11 = scmp.lt.s32.totalorder %s689_s29, %s490_s8 }
  0x34   : > { %p487_p0 = pnand %p485_p5, %p471_p2  ;;  %p493_p8 = scmp.lt.s32.totalorder %s491_s14, %s484_s24 }
  0x36   : > { %p488_p12 = pneg %p487_p0  ;;  %p494_p9 = por %p493_p8, %p492_p11 }
  0x38   : > { %p495_p10 = pnand %p494_p9, %p488_p12 }
  0x3a   : > { %498 = shalt.err (!%p495_p10)
}
  0x3b   : > { %s573_s16 = smov 128   ;;  %s574_s17 = smov 8  }
  0x3c   : > { %401 = dma.hbm_to_vmem [thread:$0]  (!%p668_p7), %s687_s19, 1024, %s689_s29, %s691_s30, %s573_s16, %s573_s16, %s574_s17  }
  0x3d   : > { %142 = sbr.rel (%p654_p13) target bundleno = 243 (0xf3), region = 28  ;;  %p817_p1 = scmp.eq.s32.totalorder (!%p654_p13), %s615_s13, 0 }
  0x44   : > { %544 = dma.done.wait (%p817_p1), [#allocation5], 16   ;;  %p818_p2 = pmov %p817_p1 }
  0x45   : > { %s726_s28 = sand.u32 1, %s561_s10   ;;  %p819_p11 = scmp.ne.s32.totalorder %s811_s20, 0 }
  0x46   : > { %546 = vsyncadd (%p818_p2), [#allocation5], 4294967280  ;;  %s371_s3 = sshll.u32 %s726_s28, 6  ;;  %s149_s25 = scalar_lea.sflag [#allocation3], %s726_s28 }
  0x47   : > { %s152_s4 = scalar_lea.vmem [#allocation6], %s371_s3 }
  0x48   : > { %548 = dma.done.wait (%p819_p11), %s149_s25, 1024  }
  0x49   : > { %550 = vsyncadd (%p819_p11), %s149_s25, 4294966272 }
  0x4a   : > { %157 = sfence }
  0x4b   : > { %v179_v0 = vld [vmem:[%s152_s4] sm:$0xff]  ;;  %v181_v1 = vld [vmem:[%s152_s4 + $0x10] sm:$0xff]  ;;  %vm187_vm0 = vcmask 130048   ;;  %v180_v7 = vld [vmem:[%s152_s4 + $0x8] sm:$0xff]  ;;  %s374_s20 = sld [smem:[#allocation2 + $0x2]]  ;;  %s376_s23 = sld [smem:[#allocation2 + $0x5]] }
  0x4c   : > { %v183_v2 = vld [vmem:[%s152_s4 + $0x20] sm:$0xff]  ;;  %v185_v3 = vld [vmem:[%s152_s4 + $0x30] sm:$0xff]  ;;  %v188_v4 = vsel %vm187_vm0, %v179_v0, 0.0  ;;  %v189_v5 = vsel %vm187_vm0, %v181_v1, 0.0  ;;  %v182_v8 = vld [vmem:[%s152_s4 + $0x18] sm:$0xff]  ;;  %v195_v12 = vsel %vm187_vm0, %v180_v7, 0.0 }
  0x4d   : > { %v191_v6 = vsel %vm187_vm0, %v183_v2, 0.0  ;;  %v190_v9 = vadd.f32 %v189_v5, %v188_v4  ;;  %v184_v10 = vld [vmem:[%s152_s4 + $0x28] sm:$0xff]  ;;  %v186_v11 = vld [vmem:[%s152_s4 + $0x38] sm:$0xff]  ;;  %v196_v13 = vsel %vm187_vm0, %v182_v8, 0.0  ;;  %v193_v14 = vsel %vm187_vm0, %v185_v3, 0.0  ;;  %s575_s26 = smov 127  }
  0x4e   : > { %v197_v15 = vadd.f32 %v196_v13, %v195_v12  ;;  %v198_v16 = vsel %vm187_vm0, %v184_v10, 0.0  ;;  %v200_v18 = vsel %vm187_vm0, %v186_v11, 0.0  ;;  %vm213_vm1 = vcmask 1046528   ;;  %s373_s29 = sld [smem:[#allocation2 + $0x1]]  ;;  %s174_s30 = sld [smem:[#allocation2]] }
  0x4f   : > { %v192_v17 = vadd.f32 %v191_v6, %v190_v9  ;;  %s372_s5 = sshll.u32 %s726_s28, 5  ;;  %s375_s7 = sld [smem:[#allocation2 + $0x4]]  ;;  %vm210_vm2 = vcmask 121856  }
  0x50   : > { %v199_v19 = vadd.f32 %v198_v16, %v197_v15  ;;  %s743_s6 = scalar_lea.vmem [#allocation7], %s372_s5  ;;  %s385_s24 = sshll.u32 %s615_s13, 9 }
  0x51   : > { %v194_v20 = vadd.f32 %v193_v14, %v192_v17  ;;  %v227_v26 = vstv %s376_s23  ;;  %s230_s19 = ssub.f32 0.0, %s374_s20  ;;  %s277_s27 = sshll.u32 %s743_s6, 4  ;;  %s758_s27 = int_to_ptr.vmem [resolvable:$true] %s277_s27 }
  0x52   : > { %v201_v21 = vadd.f32 %v200_v18, %v199_v19  ;;  %s756_s16 = scalar_lea.hbm %s806_s2, %s385_s24  ;;  %s264_s17 = scalar_lea.sflag [#allocation4], %s726_s28 }
  0x53   : > { %204 = vrot.lane.b32.xlu0 %v194_v20, %s575_s26  ;;  %v214_v22 = vrot.slane %v194_v20, 1  ;;  %v233_v33 = vstv %s230_s19  ;;  %s499_s13 = scalar_lea.vmem %s758_s27, 512  ;;  %p820_p13 = scmp.ne.s32.totalorder %s812_s21, 0 }
  0x54   : > { %v215_v23 = vrot.slane %v201_v21, 1  ;;  %v240_v39 = vstv %s373_s29  ;;  %v243_v42 = vstv %s174_s30  ;;  %p500_p12 = scmp.ne.s32.totalorder %s758_s27, %s499_s13  ;;  %s576_s3 = smov [#allocation7]  }
  0x55   : > { %v222_v48 = vstv %s375_s7  ;;  %s503_s25 = sshll.u32 %s576_s3, 4  ;;  %s504_s25 = int_to_ptr.vmem [resolvable:$false] %s503_s25 }
  0x56   : > { %v219_v24 = vsel %vm213_vm1, %v215_v23, 0.0  ;;  %v216_v25 = vsel %vm213_vm1, %v214_v22, %v215_v23  ;;  %p501_p7 = pnand %p500_p12, %p820_p13  ;;  %s505_s4 = scalar_lea.vmem %s504_s25, 1024 }
  0x57   : > { %v226_v27 = vsub.f32 %v219_v24, %v201_v21  ;;  %206 = vrot.lane.b32.xlu0 %v201_v21, %s575_s26  ;;  %v225_v28 = vsub.f32 %v216_v25, %v194_v20  ;;  %p506_p6 = scmp.lt.s32.totalorder %s758_s27, %s504_s25  ;;  %p507_p4 = scmp.lt.s32.totalorder %s505_s4, %s499_s13 }
  0x58   : > { %p502_p3 = pneg %p501_p7 }
  0x59   : > { %v228_v29 = vadd.f32 %v227_v26, %v225_v28  ;;  %v229_v30 = vadd.f32 %v227_v26, %v226_v27  ;;  %p508_p5 = por %p507_p4, %p506_p6 }
  0x5b   : > { %v246_v31 = vmul.f32 %v228_v29, %v228_v29  ;;  %v247_v32 = vmul.f32 %v229_v30, %v229_v30  ;;  %p509_p0 = pnand %p508_p5, %p502_p3 }
  0x5d   : > { %v248_v34 = vmul.f32 %v246_v31, %v233_v33  ;;  %v249_v35 = vmul.f32 %v247_v32, %v233_v33 }
  0x5f   : > { %v250_v36 = vmul.f32 1.442695, %v248_v34  ;;  %v252_v37 = vmul.f32 1.442695, %v249_v35 }
  0x61   : > { %448 = vpow2.f32 %v250_v36 }
  0x62   : > { %450 = vpow2.f32 %v252_v37 }
  0x6b   : > { %v449_v38 = vpop.eup %448 }
  0x6c   : > { %v451_v40 = vpop.eup %450  ;;  %v254_v41 = vmul.f32 %v449_v38, %v240_v39 }
  0x6d   : > { %v255_v43 = vmul.f32 %v451_v40, %v240_v39 }
  0x6e   : > { %v256_v44 = vadd.f32 %v254_v41, %v243_v42 }
  0x6f   : > { %v257_v45 = vadd.f32 %v255_v43, %v243_v42 }
  0x70   : > { %377 = vst.msk [vmem:[%s743_s6 + $0x10] sm:$0xff] %vm187_vm0, %v256_v44 }
  0x71   : > { %378 = vst.msk [vmem:[%s743_s6 + $0x18] sm:$0xff] %vm187_vm0, %v257_v45 }
  0xc5   : > { %v205_v46 = vpop.permute.xlu0 %204 }
  0xc6   : > { %v211_v47 = vsel %vm210_vm2, %v205_v46, 0.0 }
  0xc7   : > { %v220_v49 = vsub.f32 %v211_v47, %v194_v20 }
  0xc9   : > { %v223_v50 = vadd.f32 %v222_v48, %v220_v49  ;;  %v207_v51 = vpop.permute.xlu0 %206 }
  0xca   : > { %v212_v52 = vsel %vm210_vm2, %v207_v51, 0.0 }
  0xcb   : > { %v231_v53 = vmul.f32 %v223_v50, %v223_v50  ;;  %v221_v54 = vsub.f32 %v212_v52, %v201_v21 }
  0xcd   : > { %v234_v55 = vmul.f32 %v233_v33, %v231_v53  ;;  %v224_v56 = vadd.f32 %v222_v48, %v221_v54 }
  0xcf   : > { %v236_v57 = vmul.f32 1.442695, %v234_v55  ;;  %v232_v58 = vmul.f32 %v224_v56, %v224_v56 }
  0xd1   : > { %452 = vpow2.f32 %v236_v57  ;;  %v235_v59 = vmul.f32 %v233_v33, %v232_v58 }
  0xd3   : > { %v238_v60 = vmul.f32 1.442695, %v235_v59 }
  0xd5   : > { %454 = vpow2.f32 %v238_v60 }
  0xdb   : > { %v453_v61 = vpop.eup %452 }
  0xdc   : > { %v241_v62 = vmul.f32 %v453_v61, %v240_v39 }
  0xde   : > { %v244_v63 = vadd.f32 %v243_v42, %v241_v62 }
  0xdf   : > { %v455_v0 = vpop.eup %454 }
  0xe0   : > { %v242_v1 = vmul.f32 %v455_v0, %v240_v39  ;;  %258 = vst.msk [vmem:[%s743_s6] sm:$0xff] %vm187_vm0, %v244_v63 }
  0xe2   : > { %v245_v2 = vadd.f32 %v243_v42, %v242_v1 }
  0xe4   : > { %259 = vst.msk [vmem:[%s743_s6 + $0x8] sm:$0xff] %vm187_vm0, %v245_v2 }
  0xe5   : > { %512 = shalt.err (!%p509_p0)
}
  0xe6   : > { %s513_s20 = scalar_lea.hbm %s756_s16, 512  ;;  %s517_s19 = scalar_lea.hbm %s806_s2, 1024 }
  0xe7   : > { %p514_p8 = scmp.ne.s32.totalorder %s756_s16, %s513_s20  ;;  %p518_p1 = scmp.lt.u32.totalorder %s756_s16, %s806_s2 }
  0xe8   : > { %p519_p2 = scmp.lt.u32.totalorder %s517_s19, %s513_s20  ;;  %p521_p12 = scmp.lt.u32.totalorder %s513_s20, %s756_s16 }
  0xe9   : > { %p515_p9 = pnand %p514_p8, %p820_p13 }
  0xea   : > { %p520_p11 = por %p519_p2, %p518_p1 }
  0xeb   : > { %p516_p10 = pneg %p515_p9 }
  0xec   : > { %p522_p7 = por %p521_p12, %p520_p11 }
  0xee   : > { %p523_p3 = pnand %p522_p7, %p516_p10 }
  0xf0   : > { %526 = shalt.err (!%p523_p3)
}
  0xf1   : > { %s577_s5 = smov 128   ;;  %s578_s6 = smov 8  }
  0xf2   : > { %392 = dma.vmem_to_hbm [thread:$0]  (%p820_p13), %s758_s27, 512, %s756_s16, %s264_s17, %s577_s5, %s577_s5, %s578_s6  }
  0xf3 PF: > { %s292_s7 = sand.u32 1, %s557_s9   ;;  %p821_p6 = scmp.ne.s32.totalorder %s813_s22, 0 }
  0xf4   : > { %p822_p4 = scmp.ge.s32.totalorder %s569_s12, 2  ;;  %s293_s24 = scalar_lea.sflag [#allocation4], %s292_s7 }
  0xf6   : > { %p403_p5 = pnand %p822_p4, %p821_p6 }
  0xf8   : > { %552 = dma.done.wait (!%p403_p5), %s293_s24, 512  }
  0xf9   : > { %554 = vsyncadd (!%p403_p5), %s293_s24, 4294966784  ;;  %p16_p0 = scmp.ge.s32.totalorder %s619_s15, 4   ;;  %s823_s9 = smov %s561_s10 }
  0xfa   : > { %s824_s10 = smov %s565_s11  ;;  %s825_s11 = smov %s631_s18 }
  0xfb   : > { %s826_s12 = smov %s619_s15  ;;  %18 = sbr.rel (!%p16_p0) target bundleno = 6 (0x6), region = 79 }
 0x102   :  { %298 = vsyncpa [#allocation3], 1 }
 0x103   :  { %300 = vsyncpa [#allocation3 + $0x1], 1 }
 0x104   :  { %301 = vsyncpa [#allocation4], 1 }
 0x105   :  { %303 = vsyncpa [#allocation4 + $0x1], 1 }
 0x106   :  { %304 = vsyncpa [#allocation5], 1 }
 0x107   :  { %306 = vsyncpa [#allocation5 + $0x1], 1 }

</bundles_post_ra>
